<compile_context>
chip_gen: v5e
topology: v5e:2x2
jax: 0.10.0
libtpu: 0.0.40
codegen_flags: <defaults>
</compile_context>

<pallas_src>
import jax
import jax.numpy as jnp
from jax.experimental import pallas as pl
from jax.experimental.pallas import tpu as pltpu

# ----- default Discriminator hyperparameters -----
SEQ_LENGTH = 51
BATCH_SIZE = 4
CV1_OUT = 10     # C
CV1_K = 3        # conv kernel taps
CV1_S = 4        # conv stride
P1_K = 3         # pool window (M)
P1_S = 3         # pool stride

L_CONV = (SEQ_LENGTH - CV1_K) // CV1_S + 1      # 13 conv output positions
L_POOL = (L_CONV - P1_K) // P1_S + 1            # 4  (== cv1_dims)
FLAT_FEATURES = CV1_OUT * L_POOL                # 40 Linear in-features

# ----- packed, lane-dense layouts -----
K_DIM = 64                    # padded contraction dim (>= SEQ_LENGTH)
GROUP = 128                   # lanes per pool-tap group (vreg aligned)
N_LANES = P1_K * GROUP        # 384
BIAS_ROW = K_DIM              # row 64: conv bias (first GROUP lanes used)
WLIN_ROW = K_DIM + 8          # row 72: linear weight (lanes 0:FLAT_FEATURES)
BLIN_ROW = K_DIM + 16         # row 80, lane 0: linear bias
P_ROWS = K_DIM + 24           # 88 rows total (multiple of 8)


def disc_kernel(x_ref, p_ref, out_ref, xpad_ref):
    """Fused conv1d + maxpool1d + bias/ReLU + linear + sigmoid, one batch tile.

    x_ref   : (block_b, SEQ_LENGTH) f32  raw input rows
    p_ref   : (P_ROWS, N_LANES)     f32  packed parameters (prepare_params)
    out_ref : (1, block_b)          f32  sigmoid output, batch on the lane axis
    xpad_ref: (block_b, K_DIM)      f32  VMEM scratch (x zero-padded to 64 lanes)
    """
    # Stage x into a 64-lane aligned tile; pad lanes are explicit zeros so the
    # matmul contraction dim matches the packed weight rows.  Zero every step
    # (cheap) so this is correct regardless of how grid steps land on cores.
    xpad_ref[...] = jnp.zeros_like(xpad_ref)
    xpad_ref[:, 0:SEQ_LENGTH] = x_ref[...]
    x = xpad_ref[...]                                          # (bb, 64)

    w = p_ref[0:K_DIM, :]                                      # (64, 384)
    conv = jnp.dot(x, w, preferred_element_type=jnp.float32)   # (bb, 384)

    # MaxPool1d(k=3, s=3) FIRST on the raw matmul output (taps live in aligned
    # 128-lane groups), then a single bias add + ReLU on 128 lanes/row.
    # relu(max(a,b,c) + bias) == max(relu(a+bias), relu(b+bias), relu(c+bias))
    # because the bias is replicated per tap group and ReLU/+bias are monotone.
    pooled = jnp.maximum(
        jnp.maximum(conv[:, 0:GROUP], conv[:, GROUP:2 * GROUP]),
        conv[:, 2 * GROUP:3 * GROUP])                          # (bb, 128)
    pooled = jnp.maximum(
        pooled + p_ref[BIAS_ROW:BIAS_ROW + 1, 0:GROUP], 0.0)   # (bb, 128)

    # Flatten + Linear(F, 1): lane-axis reduce (padded lanes are exact 0*0).
    wlin = p_ref[WLIN_ROW:WLIN_ROW + 1, 0:GROUP]               # (1, 128)
    blin = p_ref[BLIN_ROW:BLIN_ROW + 1, 0:1]                   # (1, 1)
    logits = jnp.sum(pooled * wlin, axis=-1)[None, :] + blin   # (1, bb)

    out_ref[...] = jax.nn.sigmoid(logits).astype(out_ref.dtype)


def prepare_params(params):
    """Pack conv + linear parameters into one (P_ROWS, N_LANES) f32 buffer.

    Lane layout of the first K_DIM rows (the conv-as-matmul weight):
        lane = m*128 + j*C + c   for pool tap m, pool position j, channel c
        Wbig[p, lane] = wconv[c, k]  iff  p == (j*p1_s + m)*cv1_s + k
    Rows SEQ_LENGTH..K_DIM-1 are zero, so padded x lanes never contribute.
    """
    wconv = params["wconv"].astype(jnp.float32)                     # (C, K)
    bconv = params["bconv"].astype(jnp.float32)                     # (C,)
    wlin = params["wlin"].reshape(CV1_OUT, L_POOL).astype(jnp.float32)  # (C, Lp)
    blin = params["blin"].reshape(()).astype(jnp.float32)

    j = jnp.arange(L_POOL)
    m = jnp.arange(P1_K)
    k = jnp.arange(CV1_K)
    pos = (j[None, :, None] * P1_S + m[:, None, None]) * CV1_S + k[None, None, :]
    onehot = (jnp.arange(K_DIM)[:, None, None, None] == pos[None]).astype(jnp.float32)
    wbig = jnp.einsum("pmjk,ck->pmjc", onehot, wconv,
                      precision=jax.lax.Precision.HIGHEST)          # (64, M, Lp, C)
    wbig = wbig.reshape(K_DIM, P1_K, L_POOL * CV1_OUT)
    wbig = jnp.pad(wbig, ((0, 0), (0, 0), (0, GROUP - FLAT_FEATURES)))
    wbig = wbig.reshape(K_DIM, N_LANES)

    # Conv bias for one 128-lane group (lane = j*C + c); padded lanes are 0.
    bias_group = jnp.pad(jnp.tile(bconv, L_POOL), (0, GROUP - FLAT_FEATURES))

    # PyTorch flattens (B, C, Lp) row-major: feature f = c*Lp + j.  Our pooled
    # lane order is j*C + c, so transpose the linear weight to (Lp, C).
    wlin_jc = wlin.T.reshape(-1)                                    # (40,)

    buf = jnp.zeros((P_ROWS, N_LANES), jnp.float32)
    buf = buf.at[:K_DIM, :].set(wbig)
    buf = buf.at[BIAS_ROW, :GROUP].set(bias_group)
    buf = buf.at[WLIN_ROW, :FLAT_FEATURES].set(wlin_jc)
    buf = buf.at[BLIN_ROW, 0].set(blin)
    return buf


def _choose_block_b(batch):
    """Pick the batch tile.

    - Mem-bound kernel: bigger tiles amortize the ~0.35us/step overhead, so go
      up to the whole (8-rounded) batch for B <= 1024.
    - For larger B, use a multiple-of-128 tile (lane-dense output blocks) that
      yields >= 2 grid steps so both v7x TensorCores get work, capped at 2048
      so the per-step footprint stays inside v5e's 16 MiB default scoped VMEM.
    """
    b_r8 = ((batch + 7) // 8) * 8
    if b_r8 <= 1024:
        return b_r8
    half = ((pl.cdiv(b_r8, 2) + 127) // 128) * 128
    return min(2048, half)


@jax.jit
def discriminator_forward(x, packed_params):
    """x: (B, SEQ_LENGTH) float32 -> (B, 1) float32 (sigmoid probabilities)."""
    B, L = x.shape
    assert L == SEQ_LENGTH

    block_b = _choose_block_b(B)
    grid_n = pl.cdiv(B, block_b)
    b_pad = grid_n * block_b

    out = pl.pallas_call(
        disc_kernel,
        out_shape=jax.ShapeDtypeStruct((1, b_pad), jnp.float32),
        grid=(grid_n,),
        in_specs=[
            # x is streamed directly from HBM; last block dim == full array
            # dim (51) is legal, and the final (overhanging) block's padded
            # rows only produce lanes that get sliced off below.
            pl.BlockSpec((block_b, SEQ_LENGTH), lambda i: (i, 0)),
            pl.BlockSpec((P_ROWS, N_LANES), lambda i: (0, 0)),
        ],
        out_specs=pl.BlockSpec((1, block_b), lambda i: (0, i)),
        scratch_shapes=[pltpu.VMEM((block_b, K_DIM), jnp.float32)],
        compiler_params=pltpu.CompilerParams(
            dimension_semantics=("parallel",)),
    )(x.astype(jnp.float32), packed_params)

    return out[:, :B].T                          # (B, 1)


def reference_forward(x, params):
    """Pure-JAX reference mirroring the PyTorch forward (for self-check)."""
    B, L = x.shape
    l_idx = jnp.arange(L_CONV)[:, None] * CV1_S + jnp.arange(CV1_K)[None, :]
    patches = x[:, l_idx]                                        # (B, Lconv, K)
    conv = jnp.einsum("blk,ck->bcl", patches, params["wconv"],
                      precision=jax.lax.Precision.HIGHEST) \
        + params["bconv"][None, :, None]                         # (B, C, Lconv)
    relu = jnp.maximum(conv, 0.0)
    w_idx = jnp.arange(L_POOL)[:, None] * P1_S + jnp.arange(P1_K)[None, :]
    pooled = jnp.max(relu[:, :, w_idx], axis=-1)                 # (B, C, Lp)
    flat = pooled.reshape(B, -1)                                 # (B, F)
    logits = jnp.dot(flat, params["wlin"].T,
                     precision=jax.lax.Precision.HIGHEST) + params["blin"]
    return jax.nn.sigmoid(logits)


def init_params(key):
    k1, k2, k3, k4 = jax.random.split(key, 4)
    return {
        # Conv1d weight (out_channels, in_channels=1, k) with channel squeezed.
        "wconv": 0.3 * jax.random.normal(k1, (CV1_OUT, CV1_K), jnp.float32),
        "bconv": 0.1 * jax.random.normal(k2, (CV1_OUT,), jnp.float32),
        # Linear weight (1, F), bias (1,)
        "wlin": 0.2 * jax.random.normal(k3, (1, FLAT_FEATURES), jnp.float32),
        "blin": 0.1 * jax.random.normal(k4, (1,), jnp.float32),
    }


if __name__ == "__main__":
    key = jax.random.PRNGKey(0)
    kx, kp, kx2 = jax.random.split(key, 3)
    params = init_params(kp)
    packed = prepare_params(params)              # parameter prep (done once)

    # Small batch (single block, batch rounded up to a sublane multiple).
    x = jax.random.normal(kx, (BATCH_SIZE, SEQ_LENGTH), jnp.float32)
    out = jax.block_until_ready(discriminator_forward(x, packed))
    ref = jax.block_until_ready(reference_forward(x, params))
    assert out.shape == (BATCH_SIZE, 1)
    assert jnp.allclose(out, ref, atol=1e-4, rtol=1e-4), (out, ref)

    # Larger batch exercising the multi-block grid + overhanging last block.
    xb = jax.random.normal(kx2, (1200, SEQ_LENGTH), jnp.float32)
    outb = jax.block_until_ready(discriminator_forward(xb, packed))
    refb = jax.block_until_ready(reference_forward(xb, params))
    assert outb.shape == (1200, 1)
    assert jnp.allclose(outb, refb, atol=1e-4, rtol=1e-4)

    print("KERNEL_OK")
</pallas_src>

<mosaic_0001>
module attributes {stable_mosaic.version = 11 : i64} {
  func.func @disc_kernel(%arg0: i32, %arg1: memref<8x51xf32, #tpu.memory_space<vmem>>, %arg2: memref<88x384xf32, #tpu.memory_space<vmem>>, %arg3: memref<1x8xf32, #tpu.memory_space<vmem>>, %arg4: memref<8x64xf32, #tpu.memory_space<vmem>>) attributes {dimension_semantics = [#tpu.dimension_semantics<parallel>], iteration_bounds = array<i64: 1>, scalar_prefetch = 0 : i64, scratch_operands = 1 : i64, tpu.core_type = #tpu.core_type<tc>, window_params = [{transform_indices = @transform_0, window_bounds = array<i64: 8, 51>}, {pipeline_mode = #tpu.pipeline_mode<synchronous>, transform_indices = @transform_1, window_bounds = array<i64: 88, 384>}, {transform_indices = @transform_2, window_bounds = array<i64: 1, 8>}]} {
    %cst = arith.constant 0.000000e+00 : f32
    %0 = vector.broadcast %cst : f32 to vector<8x64xf32>
    %c0 = arith.constant 0 : index
    %c0_0 = arith.constant 0 : index
    %1 = vector.load %arg4[%c0, %c0_0] : memref<8x64xf32, #tpu.memory_space<vmem>>, vector<8x64xf32>
    tpu.vector_store %arg4[%c0, %c0_0], %0 {strides = array<i32>} : memref<8x64xf32, #tpu.memory_space<vmem>>, vector<8x64xf32>,
    %c0_1 = arith.constant 0 : index
    %c0_2 = arith.constant 0 : index
    %2 = vector.load %arg1[%c0_1, %c0_2] : memref<8x51xf32, #tpu.memory_space<vmem>>, vector<8x51xf32>
    %c0_3 = arith.constant 0 : index
    %c0_4 = arith.constant 0 : index
    %3 = vector.load %arg4[%c0_3, %c0_4] : memref<8x64xf32, #tpu.memory_space<vmem>>, vector<8x51xf32>
    tpu.vector_store %arg4[%c0_3, %c0_4], %2 {strides = array<i32>} : memref<8x64xf32, #tpu.memory_space<vmem>>, vector<8x51xf32>,
    %c0_5 = arith.constant 0 : index
    %c0_6 = arith.constant 0 : index
    %4 = vector.load %arg4[%c0_5, %c0_6] : memref<8x64xf32, #tpu.memory_space<vmem>>, vector<8x64xf32>
    %c0_7 = arith.constant 0 : index
    %c0_8 = arith.constant 0 : index
    %5 = vector.load %arg2[%c0_7, %c0_8] : memref<88x384xf32, #tpu.memory_space<vmem>>, vector<64x384xf32>
    %cst_9 = arith.constant dense<0.000000e+00> : vector<8x384xf32>
    %6 = tpu.matmul %4, %5, %cst_9 {dimension_numbers = #tpu.dot_dimension_numbers<[1], [0], [0], [1], [0, 0, 1, 1], [], []>} : vector<8x64xf32>, vector<64x384xf32>, vector<8x384xf32> -> vector<8x384xf32>
    %7 = vector.extract_strided_slice %6 {offsets = [0, 0], sizes = [8, 128], strides = [1, 1]} : vector<8x384xf32> to vector<8x128xf32>
    %8 = vector.extract_strided_slice %6 {offsets = [0, 128], sizes = [8, 128], strides = [1, 1]} : vector<8x384xf32> to vector<8x128xf32>
    %9 = arith.maximumf %7, %8 : vector<8x128xf32>
    %10 = vector.extract_strided_slice %6 {offsets = [0, 256], sizes = [8, 128], strides = [1, 1]} : vector<8x384xf32> to vector<8x128xf32>
    %11 = arith.maximumf %9, %10 : vector<8x128xf32>
    %c64 = arith.constant 64 : index
    %c0_10 = arith.constant 0 : index
    %12 = vector.load %arg2[%c64, %c0_10] : memref<88x384xf32, #tpu.memory_space<vmem>>, vector<1x128xf32>
    %13 = vector.broadcast %12 : vector<1x128xf32> to vector<8x128xf32>
    %14 = arith.addf %11, %13 : vector<8x128xf32>
    %cst_11 = arith.constant 0.000000e+00 : f32
    %15 = vector.broadcast %cst_11 : f32 to vector<8x128xf32>
    %16 = arith.maximumf %14, %15 : vector<8x128xf32>
    %c72 = arith.constant 72 : index
    %c0_12 = arith.constant 0 : index
    %17 = vector.load %arg2[%c72, %c0_12] : memref<88x384xf32, #tpu.memory_space<vmem>>, vector<1x128xf32>
    %c80 = arith.constant 80 : index
    %c0_13 = arith.constant 0 : index
    %18 = vector.load %arg2[%c80, %c0_13] : memref<88x384xf32, #tpu.memory_space<vmem>>, vector<1x1xf32>
    %19 = vector.broadcast %17 : vector<1x128xf32> to vector<8x128xf32>
    %20 = arith.mulf %16, %19 : vector<8x128xf32>
    %cst_14 = arith.constant dense<0.000000e+00> : vector<8xf32>
    %21 = vector.multi_reduction <add>, %20, %cst_14 [1] : vector<8x128xf32> to vector<8xf32>
    %22 = vector.shape_cast %21 : vector<8xf32> to vector<1x8xf32>
    %23 = vector.broadcast %18 : vector<1x1xf32> to vector<1x8xf32>
    %24 = arith.addf %22, %23 : vector<1x8xf32>
    %25 = arith.negf %24 : vector<1x8xf32>
    %26 = math.exp %25 : vector<1x8xf32>
    %cst_15 = arith.constant 1.000000e+00 : f32
    %27 = vector.broadcast %cst_15 : f32 to vector<1x8xf32>
    %28 = arith.addf %27, %26 : vector<1x8xf32>
    %29 = arith.divf %27, %28 : vector<1x8xf32>
    %c0_16 = arith.constant 0 : index
    %c0_17 = arith.constant 0 : index
    %30 = vector.load %arg3[%c0_16, %c0_17] : memref<1x8xf32, #tpu.memory_space<vmem>>, vector<1x8xf32>
    tpu.vector_store %arg3[%c0_16, %c0_17], %29 {strides = array<i32>} : memref<1x8xf32, #tpu.memory_space<vmem>>, vector<1x8xf32>,
    return
  }
  func.func @transform_0(%arg0: i32) -> (i32, i32) {
    %c0_i32 = arith.constant 0 : i32
    %c0_i32_0 = arith.constant 0 : i32
    return %arg0, %c0_i32 : i32, i32
  }
  func.func @transform_1(%arg0: i32) -> (i32, i32) {
    %c0_i32 = arith.constant 0 : i32
    %c0_i32_0 = arith.constant 0 : i32
    %c0_i32_1 = arith.constant 0 : i32
    return %c0_i32, %c0_i32_0 : i32, i32
  }
  func.func @transform_2(%arg0: i32) -> (i32, i32) {
    %c0_i32 = arith.constant 0 : i32
    %c0_i32_0 = arith.constant 0 : i32
    return %c0_i32, %arg0 : i32, i32
  }
}

</mosaic_0001>

<bundles_post_ra>
// kernel: discriminator_forward.1
= control target key start
LH: loop header
LB: loop body
LE: loop exit
PB: predicated region body
PF: predicated region fallthrough
CT: control target
= control target key end

     0   :  { %7 = vsyncpa [#allocation4], 0  ;;  %s289_s0 = inlined_call_operand.hbm [shape: f32[4,51], index: 0, kind: input, shape index: {}]   ;;  %s290_s1 = inlined_call_operand.hbm [shape: f32[88,384], index: 1, kind: input, shape index: {}]   ;;  %s291_s2 = inlined_call_operand.vmem [shape: f32[1,8], index: 2, kind: output, shape index: {}]  }
   0x1   :  { %8 = vsyncpa [#allocation6], 0 }
   0x2   :  { %12 = vsyncadd [#allocation4], 64  ;;  %s13_s11 = sshll.u32 %s289_s0, 4  ;;  %s253_s12 = smov [#allocation3]   ;;  %s14_s11 = int_to_ptr.hbm [resolvable:$true] %s13_s11 }
   0x3   :  { %s15_s13 = sshll.u32 %s253_s12, 4  ;;  %s26_s16 = sshll.u32 %s290_s1, 4  ;;  %s16_s13 = int_to_ptr.vmem [resolvable:$true] %s15_s13  ;;  %s27_s16 = int_to_ptr.hbm [resolvable:$true] %s26_s16 }
   0x4   :  { %s254_s17 = smov 64   ;;  %s255_s18 = smov 4  }
   0x5   :  { %21 = dma.hbm_to_vmem [thread:$0]  %s14_s11, 64, %s16_s13, [#allocation4], %s254_s17, %s254_s17, %s255_s18  }
   0x6   :  { %s256_s19 = smov [#allocation5]   ;;  %s257_s21 = smov 384  }
   0x7   :  { %s28_s20 = sshll.u32 %s256_s19, 4  ;;  %s258_s22 = smov 24   ;;  %s29_s20 = int_to_ptr.vmem [resolvable:$true] %s28_s20 }
   0x8   :  { %34 = dma.hbm_to_vmem [thread:$0]  %s27_s16, 4224, %s29_s20, [#allocation6], %s257_s21, %s257_s21, %s258_s22  }
   0x9   :  { %249 = dma.done.wait [#allocation4], 128  }
   0xa   :  { %250 = vsyncadd [#allocation4], 4294967168 }
   0xb   :  { %251 = dma.done.wait [#allocation6], 4224  }
   0xc   :  { %252 = vsyncadd [#allocation6], 4294963072  ;;  %vm43_vm0 = vcmask 523264   ;;  %v259_v0 = vmov 0.0   ;;  %v72_v1 = vld [vmem:[#allocation5 + $0xb8] sm:$0xff]  ;;  %v69_v2 = vld [vmem:[#allocation5 + $0xa0] sm:$0xff]  ;;  %v172_v47 = vlaneseq }
   0xd   :  { %44 = vst.msk [vmem:[#allocation2] sm:$0xff] %vm43_vm0, %v259_v0  ;;  %v70_v3 = vld [vmem:[#allocation5 + $0xa8] sm:$0xff]  ;;  %124 = vmatpush.msra.mxu2 %v72_v1  ;;  %v71_v4 = vld [vmem:[#allocation5 + $0xb0] sm:$0xff]  ;;  %v68_v7 = vld [vmem:[#allocation5 + $0x98] sm:$0xff]  ;;  %vm46_vm1 = vcmask 416768   ;;  %v260_v27 = vmov 0  }
   0xe   :  { %84 = vmatpush.msra.mxu0 %v70_v3  ;;  %v67_v5 = vld [vmem:[#allocation5 + $0x90] sm:$0xff]  ;;  %104 = vmatpush.msra.mxu1 %v71_v4  ;;  %v66_v6 = vld [vmem:[#allocation5 + $0x88] sm:$0xff]  ;;  %v64_v8 = vld [vmem:[#allocation5 + $0x78] sm:$0xff]  ;;  %v173_v52 = vand.u32 127, %v172_v47  ;;  %vm176_vm6 = vcmask 57344  }
   0xf   :  { %125 = vmatpush.msra.mxu2 %v69_v2  ;;  %v65_v9 = vld [vmem:[#allocation5 + $0x80] sm:$0xff]  ;;  %v63_v10 = vld [vmem:[#allocation5 + $0x70] sm:$0xff]  ;;  %v62_v12 = vld [vmem:[#allocation5 + $0x68] sm:$0xff]  ;;  %196 = vset.pattern.permute.xlu0 %v260_v27 }
  0x10   :  { %85 = vmatpush.msra.mxu0 %v67_v5  ;;  %105 = vmatpush.msra.mxu1 %v68_v7  ;;  %v61_v11 = vld [vmem:[#allocation5 + $0x60] sm:$0xff]  ;;  %v60_v13 = vld [vmem:[#allocation5 + $0x58] sm:$0xff]  ;;  %v58_v14 = vld [vmem:[#allocation5 + $0x48] sm:$0xff] }
  0x11   :  { %126 = vmatpush.msra.mxu2 %v66_v6  ;;  %v45_v15 = vld [vmem:[#allocation3] sm:$0xff]  ;;  %v59_v16 = vld [vmem:[#allocation5 + $0x50] sm:$0xff]  ;;  %v57_v17 = vld [vmem:[#allocation5 + $0x40] sm:$0xff] }
  0x12   :  { %86 = vmatpush.msra.mxu0 %v64_v8  ;;  %106 = vmatpush.msra.mxu1 %v65_v9  ;;  %47 = vst.msk [vmem:[#allocation2] sm:$0xff] %vm46_vm1, %v45_v15  ;;  %v55_v18 = vld [vmem:[#allocation5 + $0x30] sm:$0xff]  ;;  %v56_v19 = vld [vmem:[#allocation5 + $0x38] sm:$0xff]  ;;  %v54_v20 = vld [vmem:[#allocation5 + $0x28] sm:$0xff] }
  0x13   :  { %127 = vmatpush.msra.mxu2 %v63_v10  ;;  %v52_v21 = vld [vmem:[#allocation5 + $0x18] sm:$0xff]  ;;  %v53_v22 = vld [vmem:[#allocation5 + $0x20] sm:$0xff]  ;;  %v51_v23 = vld [vmem:[#allocation5 + $0x10] sm:$0xff] }
  0x14   :  { %87 = vmatpush.msra.mxu0 %v61_v11  ;;  %107 = vmatpush.msra.mxu1 %v62_v12  ;;  %v49_v24 = vld [vmem:[#allocation5] sm:$0xff]  ;;  %v50_v25 = vld [vmem:[#allocation5 + $0x8] sm:$0xff]  ;;  %v141_v35 = vld [vmem:[#allocation5 + $0xd8] ss:$0 sm:$0xff] }
  0x15   :  { %128 = vmatpush.msra.mxu2 %v60_v13  ;;  %v138_v32 = vld [vmem:[#allocation5 + $0xc0] ss:$0 sm:$0xff]  ;;  %v142_v38 = vld [vmem:[#allocation5 + $0xf0] ss:$0 sm:$0xff] }
  0x16   :  { %88 = vmatpush.msra.mxu0 %v58_v14  ;;  %108 = vmatpush.msra.mxu1 %v59_v16 }
  0x17   :  { %129 = vmatpush.msra.mxu2 %v57_v17 }
  0x18   :  { %89 = vmatpush.msra.mxu0 %v55_v18  ;;  %109 = vmatpush.msra.mxu1 %v56_v19 }
  0x19   :  { %130 = vmatpush.msra.mxu2 %v54_v20  ;;  %v48_v26 = vld [vmem:[#allocation2] sm:$0xff] }
  0x1a   :  { %90 = vmatpush.msra.mxu0 %v52_v21  ;;  %110 = vmatpush.msra.mxu1 %v53_v22 }
  0x1b   :  { %131 = vmatpush.msra.mxu2 %v51_v23 }
  0x1c   :  { %91 = vmatpush.msra.mxu0 %v49_v24  ;;  %186 = vmatmul.msk.f32.vlgmr.msra.gmra.mxu2 %vm43_vm0, %v48_v26 }
  0x1d   :  { %111 = vmatpush.msra.mxu1 %v50_v25  ;;  %184 = vmatmul.msk.f32.vlgmr.msra.gmra.mxu0 %vm43_vm0, %v48_v26 }
  0x1e   :  { %185 = vmatmul.msk.f32.vlgmr.msra.gmra.mxu1 %vm43_vm0, %v48_v26 }
  0x9a   :  { %v93_v28 = vpop.f32.mrf.mxu0 }
  0x9b   :  { %v113_v29 = vpop.f32.mrf.mxu1 }
  0x9c   :  { %v136_v30 = vmax.f32 %v93_v28, %v113_v29 }
  0x9f   :  { %v133_v31 = vpop.f32.mrf.mxu2 }
  0xa0   :  { %v137_v33 = vmax.f32 %v136_v30, %v133_v31 }
  0xa2   :  { %v139_v34 = vadd.f32 %v138_v32, %v137_v33 }
  0xa4   :  { %v140_v36 = vmax.f32 %v139_v34, 0.0 }
  0xa6   :  { %v143_v37 = vmul.f32 %v141_v35, %v140_v36 }
  0xa8   :  { %144 = vadd.xlane.f32.xlu0 %v143_v37 }
  0xbc   :  { %148 = vperm.xlu0 %196, %v142_v38  }
 0x11b   :  { %v145_v39 = vpop.xlane.xlu0 %144 }
 0x12e   :  { %v149_v40 = vpop.permute.xlu0 %148 }
 0x12f   :  { %v151_v41 = vadd.f32 %v149_v40, %v145_v39 }
 0x131   :  { %v187_v42 = vmul.f32 -1.442695, %v151_v41 }
 0x133   :  { %197 = vpow2.f32 %v187_v42 }
 0x139   :  { %v198_v43 = vpop.eup %197 }
 0x13a   :  { %v155_v44 = vadd.f32 1.0, %v198_v43 }
 0x13c   :  { %199 = vrcp.f32 %v155_v44  ;;  %v167_v49 = vand.u32 2147483648, %v155_v44  ;;  %v165_v51 = vand.u32 2147483647, %v155_v44  ;;  %vm161_vm3 = vweird.f32 %v155_v44 }
 0x13e   :  { %v168_v54 = vor.u32 1.1754944e-38, %v167_v49  ;;  %vm166_vm5 = vcmp.eq.f32.partialorder %v165_v51, 8.507059e+37 }
 0x142   :  { %v200_v45 = vpop.eup %199 }
 0x143   :  { %v157_v46 = vmul.f32 %v200_v45, %v155_v44  ;;  %vm162_vm2 = vweird.f32 %v200_v45 }
 0x144   :  { %vm163_vm4 = vmor %vm161_vm3, %vm162_vm2 }
 0x145   :  { %v158_v48 = vsub.f32 1.0, %v157_v46 }
 0x147   :  { %v159_v50 = vmul.f32 %v200_v45, %v158_v48 }
 0x149   :  { %v160_v53 = vadd.f32 %v200_v45, %v159_v50 }
 0x14b   :  { %v164_v55 = vsel %vm163_vm4, %v200_v45, %v160_v53 }
 0x14c   :  { %v169_v56 = vsel %vm166_vm5, %v168_v54, %v164_v55 }
 0x14d   :  { %v174_v57 = vperm.slane %v169_v56, %v173_v52 }
 0x14f   :  { %177 = vst.msk [vmem:[%s291_s2] sm:$0x1] %vm176_vm6, %v174_v57 }
 0x150   :  { %182 = vsyncpa [#allocation4], 1 }
 0x151   :  { %183 = vsyncpa [#allocation6], 1 }

</bundles_post_ra>
